<compile_context>
chip_gen: v7x
topology: tpu7x:2x2x1
jax: 0.10.0
libtpu: 0.0.40
codegen_flags: <defaults>
</compile_context>

<pallas_src>
import jax
import jax.numpy as jnp
from jax.experimental import pallas as pl
from jax.experimental.pallas import tpu as pltpu

# ---- model hyper-parameters (small, consistent with the module) ----
INPUT_DIM = 16      # vocab size (>= SEQ so pos_embedding lookup is valid)
D_MODEL = 32
PF_DIM = 64
N_LAYERS = 2
BATCH = 2
SEQ = 8
LN_EPS = 1e-5       # PyTorch nn.LayerNorm default
NEG_INF = -1e10

# rows of the packed per-layer vector slab (shape (8, 3*D_MODEL))
_ROW_BQKV, _ROW_BF1, _ROW_BO, _ROW_G1, _ROW_BE1, _ROW_BF2, _ROW_G2, _ROW_BE2 = range(8)


# ------------------------- fused Pallas kernel -------------------------

def _encoder_fused_kernel(onehot_ref, emb_ref, bias_ref,
                          wqkv_ref, wo_ref, w1_ref, w2_ref, vec_ref,
                          o_ref):
    D = emb_ref.shape[1]
    L = wqkv_ref.shape[0]
    PF = w1_ref.shape[2]

    # ---- embedding gather + sqrt(D) scale + positional add in ONE matmul ----
    # onehot is (BS, V+S): 1 at the token column (weights pre-scaled by sqrt(D))
    # and 1 at the V+pos column, so the dot yields tok*sqrt(D) + pos directly.
    x = jnp.dot(onehot_ref[...], emb_ref[...],
                preferred_element_type=jnp.float32)                  # (BS, D)

    # (BS, BS) additive mask: key-pad entries and cross-batch entries = -1e10.
    bias = bias_ref[...]

    def layer_norm(h, gamma, beta):
        mu = jnp.mean(h, axis=-1, keepdims=True)
        var = jnp.mean(h * h, axis=-1, keepdims=True) - mu * mu      # one-pass var
        return (h - mu) * jax.lax.rsqrt(var + LN_EPS) * gamma + beta

    for l in range(L):                       # static unrolled loop over layers
        wqkv = wqkv_ref[l]                   # (D, 3D), Q block pre-scaled 1/sqrt(D)
        wo = wo_ref[l]                       # (D, D)
        w1 = w1_ref[l]                       # (D, PF)
        w2 = w2_ref[l]                       # (PF, D)
        vec = vec_ref[l]                     # (8, 3D) packed bias / LN slab
        b_qkv = vec[_ROW_BQKV:_ROW_BQKV + 1, :]
        bf1 = vec[_ROW_BF1:_ROW_BF1 + 1, 0:PF]
        bo = vec[_ROW_BO:_ROW_BO + 1, 0:D]
        g1 = vec[_ROW_G1:_ROW_G1 + 1, 0:D]
        be1 = vec[_ROW_BE1:_ROW_BE1 + 1, 0:D]
        bf2 = vec[_ROW_BF2:_ROW_BF2 + 1, 0:D]
        g2 = vec[_ROW_G2:_ROW_G2 + 1, 0:D]
        be2 = vec[_ROW_BE2:_ROW_BE2 + 1, 0:D]

        # ---- fused QKV projection over the whole (B*S, D) batch ----
        qkv = jnp.dot(x, wqkv, preferred_element_type=jnp.float32) + b_qkv
        q = qkv[:, 0:D]
        k = qkv[:, D:2 * D]
        v = qkv[:, 2 * D:3 * D]

        # ---- block-diagonal single-head self-attention over the full slab ----
        # q . k^T via transposed contraction (no explicit transpose); the mask
        # kills cross-batch and padded-key entries.
        e = jax.lax.dot_general(q, k, (((1,), (1,)), ((), ())),
                                preferred_element_type=jnp.float32)   # (BS, BS)
        e = e + bias
        e = e - jnp.max(e, axis=-1, keepdims=True)
        p = jnp.exp(e)
        p = p * pl.reciprocal(jnp.sum(p, axis=-1, keepdims=True), approx=True)
        attn = jnp.dot(p, v, preferred_element_type=jnp.float32)      # (BS, D)
        attn = jnp.dot(attn, wo, preferred_element_type=jnp.float32) + bo

        # ---- residual + LayerNorm 1 ----
        h = layer_norm(x + attn, g1, be1)

        # ---- position-wise feed-forward ----
        f = jnp.dot(h, w1, preferred_element_type=jnp.float32) + bf1
        f = jnp.maximum(f, 0.0)
        f = jnp.dot(f, w2, preferred_element_type=jnp.float32) + bf2

        # ---- residual + LayerNorm 2 ----
        x = layer_norm(h + f, g2, be2)

    o_ref[...] = x.astype(o_ref.dtype)


# ------------------------- wrapper -------------------------

@jax.jit
def encoder_forward(src, src_mask, packed):
    """src: (B, S) int32 token ids; src_mask: (B, S) float {0,1}."""
    B, S = src.shape
    D = packed["emb"].shape[1]
    V = packed["emb"].shape[0] - S           # packed emb = [tok_emb*sqrt(D); pos_emb[:S]]
    BS = B * S

    # (BS, V+S) one-hot-with-position matrix; the single gather matmul in the
    # kernel then yields tok*sqrt(D) + pos directly.
    ids = src.reshape(BS).astype(jnp.int32)
    onehot_tok = jax.nn.one_hot(ids, V, dtype=jnp.float32)            # (BS, V)
    onehot_pos = jnp.tile(jnp.eye(S, dtype=jnp.float32), (B, 1))      # (BS, S)
    onehot = jnp.concatenate([onehot_tok, onehot_pos], axis=1)        # (BS, V+S)

    # (BS, BS) additive attention mask for block-diagonal attention:
    # cross-batch entries AND padded-key entries -> -1e10, else 0.
    bid = jnp.repeat(jnp.arange(B, dtype=jnp.int32), S)               # (BS,)
    same_batch = bid[:, None] == bid[None, :]                         # (BS, BS)
    key_valid = (src_mask.reshape(BS) > 0)                            # (BS,)
    allowed = jnp.logical_and(same_batch, key_valid[None, :])
    bias2d = jnp.where(allowed, 0.0, NEG_INF).astype(jnp.float32)

    vmem = lambda: pl.BlockSpec(memory_space=pltpu.MemorySpace.VMEM)
    out_flat = pl.pallas_call(
        _encoder_fused_kernel,
        out_shape=jax.ShapeDtypeStruct((BS, D), jnp.float32),
        in_specs=[vmem() for _ in range(8)],
        out_specs=vmem(),
    )(onehot, packed["emb"], bias2d,
      packed["wqkv"], packed["wo"], packed["w1"], packed["w2"], packed["vecs"])
    return out_flat.reshape(B, S, D)


# ------------------------- deterministic param init & packing -------------------------

def init_params(key):
    keys = jax.random.split(key, 2 + N_LAYERS)
    params = {
        "tok_emb": 0.02 * jax.random.normal(keys[0], (INPUT_DIM, D_MODEL), jnp.float32),
        "pos_emb": 0.02 * jax.random.normal(keys[1], (INPUT_DIM, D_MODEL), jnp.float32),
        "layers": [],
    }
    for i in range(N_LAYERS):
        ks = jax.random.split(keys[2 + i], 6)
        lp = {
            "wq": 0.05 * jax.random.normal(ks[0], (D_MODEL, D_MODEL), jnp.float32),
            "bq": jnp.zeros((1, D_MODEL), jnp.float32),
            "wk": 0.05 * jax.random.normal(ks[1], (D_MODEL, D_MODEL), jnp.float32),
            "bk": jnp.zeros((1, D_MODEL), jnp.float32),
            "wv": 0.05 * jax.random.normal(ks[2], (D_MODEL, D_MODEL), jnp.float32),
            "bv": jnp.zeros((1, D_MODEL), jnp.float32),
            "wo": 0.05 * jax.random.normal(ks[3], (D_MODEL, D_MODEL), jnp.float32),
            "bo": jnp.zeros((1, D_MODEL), jnp.float32),
            "g1": jnp.ones((1, D_MODEL), jnp.float32),
            "be1": jnp.zeros((1, D_MODEL), jnp.float32),
            "w1": 0.05 * jax.random.normal(ks[4], (D_MODEL, PF_DIM), jnp.float32),
            "bf1": jnp.zeros((1, PF_DIM), jnp.float32),
            "w2": 0.05 * jax.random.normal(ks[5], (PF_DIM, D_MODEL), jnp.float32),
            "bf2": jnp.zeros((1, D_MODEL), jnp.float32),
            "g2": jnp.ones((1, D_MODEL), jnp.float32),
            "be2": jnp.zeros((1, D_MODEL), jnp.float32),
        }
        params["layers"].append(lp)
    return params


def pack_params(params):
    """Pack for the fused kernel:
       - emb: (V+S, D) = [tok_emb * sqrt(D) ; pos_emb[:S]]  (scale + pos folded)
       - wqkv: (L, D, 3D) with the Q block (and bq) pre-scaled by 1/sqrt(D)
       - small (1, D)/(1, PF) vectors packed into one (L, 8, 3D) slab."""
    assert SEQ <= INPUT_DIM, "pos_embedding lookup requires SEQ <= INPUT_DIM"
    W = 3 * D_MODEL
    emb_scale = float(D_MODEL) ** 0.5
    inv_attn_scale = 1.0 / (float(D_MODEL) ** 0.5)

    emb = jnp.concatenate([params["tok_emb"] * emb_scale,
                           params["pos_emb"][:SEQ]], axis=0)          # (V+S, D)

    def pad(v):  # (1, n) -> (1, W)
        return jnp.pad(v, ((0, 0), (0, W - v.shape[1])))

    wqkv, wo, w1, w2, vecs = [], [], [], [], []
    for lp in params["layers"]:
        wqkv.append(jnp.concatenate(
            [lp["wq"] * inv_attn_scale, lp["wk"], lp["wv"]], axis=1))
        wo.append(lp["wo"])
        w1.append(lp["w1"])
        w2.append(lp["w2"])
        rows = [jnp.concatenate([lp["bq"] * inv_attn_scale, lp["bk"], lp["bv"]],
                                axis=1),                              # _ROW_BQKV
                pad(lp["bf1"]),                                       # _ROW_BF1
                pad(lp["bo"]),                                        # _ROW_BO
                pad(lp["g1"]),                                        # _ROW_G1
                pad(lp["be1"]),                                       # _ROW_BE1
                pad(lp["bf2"]),                                       # _ROW_BF2
                pad(lp["g2"]),                                        # _ROW_G2
                pad(lp["be2"])]                                       # _ROW_BE2
        vecs.append(jnp.concatenate(rows, axis=0))                    # (8, 3D)
    return {
        "emb": emb,                # (V+S, D)
        "wqkv": jnp.stack(wqkv),   # (L, D, 3D)
        "wo": jnp.stack(wo),       # (L, D, D)
        "w1": jnp.stack(w1),       # (L, D, PF)
        "w2": jnp.stack(w2),       # (L, PF, D)
        "vecs": jnp.stack(vecs),   # (L, 8, 3D)
    }


# ------------------------- pure-JAX reference -------------------------

def _layer_norm_ref(h, g, b):
    mu = jnp.mean(h, axis=-1, keepdims=True)
    var = jnp.mean((h - mu) ** 2, axis=-1, keepdims=True)
    return (h - mu) * jax.lax.rsqrt(var + LN_EPS) * g + b


def reference_forward(src, src_mask, params):
    scale = jnp.sqrt(jnp.float32(D_MODEL))
    attn_scale = jnp.sqrt(jnp.float32(D_MODEL))
    tok = jnp.take(params["tok_emb"], src, axis=0)
    pos = params["pos_emb"][: src.shape[1]]
    x = tok * scale + pos[None]
    for lp in params["layers"]:
        q = x @ lp["wq"] + lp["bq"]
        k = x @ lp["wk"] + lp["bk"]
        v = x @ lp["wv"] + lp["bv"]
        energy = jnp.einsum("bqd,bkd->bqk", q, k) / attn_scale
        energy = jnp.where(src_mask[:, None, :] > 0, energy, NEG_INF)
        p = jax.nn.softmax(energy, axis=-1)
        attn = jnp.einsum("bqk,bkd->bqd", p, v) @ lp["wo"] + lp["bo"]
        h = _layer_norm_ref(x + attn, lp["g1"], lp["be1"])
        f = jnp.maximum(h @ lp["w1"] + lp["bf1"], 0.0) @ lp["w2"] + lp["bf2"]
        x = _layer_norm_ref(h + f, lp["g2"], lp["be2"])
    return x


# ------------------------- main -------------------------

if __name__ == "__main__":
    root = jax.random.PRNGKey(0)
    k_param, k_src = jax.random.split(root)

    params = init_params(k_param)
    packed = pack_params(params)

    src = jax.random.randint(k_src, (BATCH, SEQ), 0, INPUT_DIM, dtype=jnp.int32)
    src_mask = (src != 0).astype(jnp.float32)   # pad token id = 0

    out = encoder_forward(src, src_mask, packed)
    out = jax.block_until_ready(out)

    ref = reference_forward(src, src_mask, params)
    assert out.shape == (BATCH, SEQ, D_MODEL)
    # tolerance loosened slightly for the EUP approximate reciprocal used in
    # the in-kernel softmax normalization.
    assert jnp.allclose(out, ref, atol=2e-3, rtol=2e-3), "mismatch vs JAX reference"

    print("KERNEL_OK")
</pallas_src>

<mosaic_0001>
module attributes {stable_mosaic.version = 11 : i64} {
  func.func @_encoder_fused_kernel(%arg0: memref<16x24xf32, #tpu.memory_space<vmem>>, %arg1: memref<24x32xf32, #tpu.memory_space<vmem>>, %arg2: memref<16x16xf32, #tpu.memory_space<vmem>>, %arg3: memref<2x32x96xf32, #tpu.memory_space<vmem>>, %arg4: memref<2x32x32xf32, #tpu.memory_space<vmem>>, %arg5: memref<2x32x64xf32, #tpu.memory_space<vmem>>, %arg6: memref<2x64x32xf32, #tpu.memory_space<vmem>>, %arg7: memref<2x8x96xf32, #tpu.memory_space<vmem>>, %arg8: memref<16x32xf32, #tpu.memory_space<vmem>>) attributes {dimension_semantics = [], scalar_prefetch = 0 : i64, scratch_operands = 0 : i64, tpu.core_type = #tpu.core_type<tc>} {
    %c0 = arith.constant 0 : index
    %c0_0 = arith.constant 0 : index
    %0 = vector.load %arg0[%c0, %c0_0] : memref<16x24xf32, #tpu.memory_space<vmem>>, vector<16x24xf32>
    %c0_1 = arith.constant 0 : index
    %c0_2 = arith.constant 0 : index
    %1 = vector.load %arg1[%c0_1, %c0_2] : memref<24x32xf32, #tpu.memory_space<vmem>>, vector<24x32xf32>
    %cst = arith.constant dense<0.000000e+00> : vector<16x32xf32>
    %2 = tpu.matmul %0, %1, %cst {dimension_numbers = #tpu.dot_dimension_numbers<[1], [0], [0], [1], [0, 0, 1, 1], [], []>} : vector<16x24xf32>, vector<24x32xf32>, vector<16x32xf32> -> vector<16x32xf32>
    %c0_3 = arith.constant 0 : index
    %c0_4 = arith.constant 0 : index
    %3 = vector.load %arg2[%c0_3, %c0_4] : memref<16x16xf32, #tpu.memory_space<vmem>>, vector<16x16xf32>
    %c0_5 = arith.constant 0 : index
    %c0_6 = arith.constant 0 : index
    %c0_7 = arith.constant 0 : index
    %4 = vector.load %arg3[%c0_5, %c0_6, %c0_7] : memref<2x32x96xf32, #tpu.memory_space<vmem>>, vector<1x32x96xf32>
    %5 = vector.shape_cast %4 : vector<1x32x96xf32> to vector<32x96xf32>
    %c0_8 = arith.constant 0 : index
    %c0_9 = arith.constant 0 : index
    %c0_10 = arith.constant 0 : index
    %6 = vector.load %arg4[%c0_8, %c0_9, %c0_10] : memref<2x32x32xf32, #tpu.memory_space<vmem>>, vector<1x32x32xf32>
    %7 = vector.shape_cast %6 : vector<1x32x32xf32> to vector<32x32xf32>
    %c0_11 = arith.constant 0 : index
    %c0_12 = arith.constant 0 : index
    %c0_13 = arith.constant 0 : index
    %8 = vector.load %arg5[%c0_11, %c0_12, %c0_13] : memref<2x32x64xf32, #tpu.memory_space<vmem>>, vector<1x32x64xf32>
    %9 = vector.shape_cast %8 : vector<1x32x64xf32> to vector<32x64xf32>
    %c0_14 = arith.constant 0 : index
    %c0_15 = arith.constant 0 : index
    %c0_16 = arith.constant 0 : index
    %10 = vector.load %arg6[%c0_14, %c0_15, %c0_16] : memref<2x64x32xf32, #tpu.memory_space<vmem>>, vector<1x64x32xf32>
    %11 = vector.shape_cast %10 : vector<1x64x32xf32> to vector<64x32xf32>
    %c0_17 = arith.constant 0 : index
    %c0_18 = arith.constant 0 : index
    %c0_19 = arith.constant 0 : index
    %12 = vector.load %arg7[%c0_17, %c0_18, %c0_19] : memref<2x8x96xf32, #tpu.memory_space<vmem>>, vector<1x8x96xf32>
    %13 = vector.shape_cast %12 : vector<1x8x96xf32> to vector<8x96xf32>
    %14 = vector.extract_strided_slice %13 {offsets = [0, 0], sizes = [1, 96], strides = [1, 1]} : vector<8x96xf32> to vector<1x96xf32>
    %15 = vector.extract_strided_slice %13 {offsets = [1, 0], sizes = [1, 64], strides = [1, 1]} : vector<8x96xf32> to vector<1x64xf32>
    %16 = vector.extract_strided_slice %13 {offsets = [2, 0], sizes = [1, 32], strides = [1, 1]} : vector<8x96xf32> to vector<1x32xf32>
    %17 = vector.extract_strided_slice %13 {offsets = [3, 0], sizes = [1, 32], strides = [1, 1]} : vector<8x96xf32> to vector<1x32xf32>
    %18 = vector.extract_strided_slice %13 {offsets = [4, 0], sizes = [1, 32], strides = [1, 1]} : vector<8x96xf32> to vector<1x32xf32>
    %19 = vector.extract_strided_slice %13 {offsets = [5, 0], sizes = [1, 32], strides = [1, 1]} : vector<8x96xf32> to vector<1x32xf32>
    %20 = vector.extract_strided_slice %13 {offsets = [6, 0], sizes = [1, 32], strides = [1, 1]} : vector<8x96xf32> to vector<1x32xf32>
    %21 = vector.extract_strided_slice %13 {offsets = [7, 0], sizes = [1, 32], strides = [1, 1]} : vector<8x96xf32> to vector<1x32xf32>
    %cst_20 = arith.constant dense<0.000000e+00> : vector<16x96xf32>
    %22 = tpu.matmul %2, %5, %cst_20 {dimension_numbers = #tpu.dot_dimension_numbers<[1], [0], [0], [1], [0, 0, 1, 1], [], []>} : vector<16x32xf32>, vector<32x96xf32>, vector<16x96xf32> -> vector<16x96xf32>
    %23 = vector.broadcast %14 : vector<1x96xf32> to vector<16x96xf32>
    %24 = arith.addf %22, %23 : vector<16x96xf32>
    %25 = vector.extract_strided_slice %24 {offsets = [0, 0], sizes = [16, 32], strides = [1, 1]} : vector<16x96xf32> to vector<16x32xf32>
    %26 = vector.extract_strided_slice %24 {offsets = [0, 32], sizes = [16, 32], strides = [1, 1]} : vector<16x96xf32> to vector<16x32xf32>
    %27 = vector.extract_strided_slice %24 {offsets = [0, 64], sizes = [16, 32], strides = [1, 1]} : vector<16x96xf32> to vector<16x32xf32>
    %cst_21 = arith.constant dense<0.000000e+00> : vector<16x16xf32>
    %28 = tpu.matmul %25, %26, %cst_21 {dimension_numbers = #tpu.dot_dimension_numbers<[1], [1], [0], [0], [0, 0, 1, 0], [], []>} : vector<16x32xf32>, vector<16x32xf32>, vector<16x16xf32> -> vector<16x16xf32>
    %29 = arith.addf %28, %3 : vector<16x16xf32>
    %cst_22 = arith.constant dense<0xFF800000> : vector<16xf32>
    %30 = vector.multi_reduction <maximumf>, %29, %cst_22 [1] : vector<16x16xf32> to vector<16xf32>
    %31 = vector.shape_cast %30 : vector<16xf32> to vector<16x1xf32>
    %32 = vector.broadcast %31 : vector<16x1xf32> to vector<16x16xf32>
    %33 = arith.subf %29, %32 : vector<16x16xf32>
    %34 = math.exp %33 : vector<16x16xf32>
    %cst_23 = arith.constant dense<0.000000e+00> : vector<16xf32>
    %35 = vector.multi_reduction <add>, %34, %cst_23 [1] : vector<16x16xf32> to vector<16xf32>
    %36 = vector.shape_cast %35 : vector<16xf32> to vector<16x1xf32>
    %37 = tpu.reciprocal %36 {approx = true} : vector<16x1xf32> -> vector<16x1xf32>
    %38 = vector.broadcast %37 : vector<16x1xf32> to vector<16x16xf32>
    %39 = arith.mulf %34, %38 : vector<16x16xf32>
    %cst_24 = arith.constant dense<0.000000e+00> : vector<16x32xf32>
    %40 = tpu.matmul %39, %27, %cst_24 {dimension_numbers = #tpu.dot_dimension_numbers<[1], [0], [0], [1], [0, 0, 1, 1], [], []>} : vector<16x16xf32>, vector<16x32xf32>, vector<16x32xf32> -> vector<16x32xf32>
    %cst_25 = arith.constant dense<0.000000e+00> : vector<16x32xf32>
    %41 = tpu.matmul %40, %7, %cst_25 {dimension_numbers = #tpu.dot_dimension_numbers<[1], [0], [0], [1], [0, 0, 1, 1], [], []>} : vector<16x32xf32>, vector<32x32xf32>, vector<16x32xf32> -> vector<16x32xf32>
    %42 = vector.broadcast %16 : vector<1x32xf32> to vector<16x32xf32>
    %43 = arith.addf %41, %42 : vector<16x32xf32>
    %44 = arith.addf %2, %43 : vector<16x32xf32>
    %cst_26 = arith.constant dense<0.000000e+00> : vector<16xf32>
    %45 = vector.multi_reduction <add>, %44, %cst_26 [1] : vector<16x32xf32> to vector<16xf32>
    %46 = vector.shape_cast %45 : vector<16xf32> to vector<16x1xf32>
    %cst_27 = arith.constant 3.200000e+01 : f32
    %47 = vector.broadcast %cst_27 : f32 to vector<16x1xf32>
    %48 = arith.divf %46, %47 : vector<16x1xf32>
    %49 = arith.mulf %44, %44 : vector<16x32xf32>
    %cst_28 = arith.constant dense<0.000000e+00> : vector<16xf32>
    %50 = vector.multi_reduction <add>, %49, %cst_28 [1] : vector<16x32xf32> to vector<16xf32>
    %51 = vector.shape_cast %50 : vector<16xf32> to vector<16x1xf32>
    %cst_29 = arith.constant 3.200000e+01 : f32
    %52 = vector.broadcast %cst_29 : f32 to vector<16x1xf32>
    %53 = arith.divf %51, %52 : vector<16x1xf32>
    %54 = arith.mulf %48, %48 : vector<16x1xf32>
    %55 = arith.subf %53, %54 : vector<16x1xf32>
    %56 = vector.broadcast %48 : vector<16x1xf32> to vector<16x32xf32>
    %57 = arith.subf %44, %56 : vector<16x32xf32>
    %cst_30 = arith.constant 9.99999974E-6 : f32
    %58 = vector.broadcast %cst_30 : f32 to vector<16x1xf32>
    %59 = arith.addf %55, %58 : vector<16x1xf32>
    %60 = math.rsqrt %59 : vector<16x1xf32>
    %61 = vector.broadcast %60 : vector<16x1xf32> to vector<16x32xf32>
    %62 = arith.mulf %57, %61 : vector<16x32xf32>
    %63 = vector.broadcast %17 : vector<1x32xf32> to vector<16x32xf32>
    %64 = arith.mulf %62, %63 : vector<16x32xf32>
    %65 = vector.broadcast %18 : vector<1x32xf32> to vector<16x32xf32>
    %66 = arith.addf %64, %65 : vector<16x32xf32>
    %cst_31 = arith.constant dense<0.000000e+00> : vector<16x64xf32>
    %67 = tpu.matmul %66, %9, %cst_31 {dimension_numbers = #tpu.dot_dimension_numbers<[1], [0], [0], [1], [0, 0, 1, 1], [], []>} : vector<16x32xf32>, vector<32x64xf32>, vector<16x64xf32> -> vector<16x64xf32>
    %68 = vector.broadcast %15 : vector<1x64xf32> to vector<16x64xf32>
    %69 = arith.addf %67, %68 : vector<16x64xf32>
    %cst_32 = arith.constant 0.000000e+00 : f32
    %70 = vector.broadcast %cst_32 : f32 to vector<16x64xf32>
    %71 = arith.maximumf %69, %70 : vector<16x64xf32>
    %cst_33 = arith.constant dense<0.000000e+00> : vector<16x32xf32>
    %72 = tpu.matmul %71, %11, %cst_33 {dimension_numbers = #tpu.dot_dimension_numbers<[1], [0], [0], [1], [0, 0, 1, 1], [], []>} : vector<16x64xf32>, vector<64x32xf32>, vector<16x32xf32> -> vector<16x32xf32>
    %73 = vector.broadcast %19 : vector<1x32xf32> to vector<16x32xf32>
    %74 = arith.addf %72, %73 : vector<16x32xf32>
    %75 = arith.addf %66, %74 : vector<16x32xf32>
    %cst_34 = arith.constant dense<0.000000e+00> : vector<16xf32>
    %76 = vector.multi_reduction <add>, %75, %cst_34 [1] : vector<16x32xf32> to vector<16xf32>
    %77 = vector.shape_cast %76 : vector<16xf32> to vector<16x1xf32>
    %cst_35 = arith.constant 3.200000e+01 : f32
    %78 = vector.broadcast %cst_35 : f32 to vector<16x1xf32>
    %79 = arith.divf %77, %78 : vector<16x1xf32>
    %80 = arith.mulf %75, %75 : vector<16x32xf32>
    %cst_36 = arith.constant dense<0.000000e+00> : vector<16xf32>
    %81 = vector.multi_reduction <add>, %80, %cst_36 [1] : vector<16x32xf32> to vector<16xf32>
    %82 = vector.shape_cast %81 : vector<16xf32> to vector<16x1xf32>
    %cst_37 = arith.constant 3.200000e+01 : f32
    %83 = vector.broadcast %cst_37 : f32 to vector<16x1xf32>
    %84 = arith.divf %82, %83 : vector<16x1xf32>
    %85 = arith.mulf %79, %79 : vector<16x1xf32>
    %86 = arith.subf %84, %85 : vector<16x1xf32>
    %87 = vector.broadcast %79 : vector<16x1xf32> to vector<16x32xf32>
    %88 = arith.subf %75, %87 : vector<16x32xf32>
    %cst_38 = arith.constant 9.99999974E-6 : f32
    %89 = vector.broadcast %cst_38 : f32 to vector<16x1xf32>
    %90 = arith.addf %86, %89 : vector<16x1xf32>
    %91 = math.rsqrt %90 : vector<16x1xf32>
    %92 = vector.broadcast %91 : vector<16x1xf32> to vector<16x32xf32>
    %93 = arith.mulf %88, %92 : vector<16x32xf32>
    %94 = vector.broadcast %20 : vector<1x32xf32> to vector<16x32xf32>
    %95 = arith.mulf %93, %94 : vector<16x32xf32>
    %96 = vector.broadcast %21 : vector<1x32xf32> to vector<16x32xf32>
    %97 = arith.addf %95, %96 : vector<16x32xf32>
    %c1 = arith.constant 1 : index
    %c0_39 = arith.constant 0 : index
    %c0_40 = arith.constant 0 : index
    %98 = vector.load %arg3[%c1, %c0_39, %c0_40] : memref<2x32x96xf32, #tpu.memory_space<vmem>>, vector<1x32x96xf32>
    %99 = vector.shape_cast %98 : vector<1x32x96xf32> to vector<32x96xf32>
    %c1_41 = arith.constant 1 : index
    %c0_42 = arith.constant 0 : index
    %c0_43 = arith.constant 0 : index
    %100 = vector.load %arg4[%c1_41, %c0_42, %c0_43] : memref<2x32x32xf32, #tpu.memory_space<vmem>>, vector<1x32x32xf32>
    %101 = vector.shape_cast %100 : vector<1x32x32xf32> to vector<32x32xf32>
    %c1_44 = arith.constant 1 : index
    %c0_45 = arith.constant 0 : index
    %c0_46 = arith.constant 0 : index
    %102 = vector.load %arg5[%c1_44, %c0_45, %c0_46] : memref<2x32x64xf32, #tpu.memory_space<vmem>>, vector<1x32x64xf32>
    %103 = vector.shape_cast %102 : vector<1x32x64xf32> to vector<32x64xf32>
    %c1_47 = arith.constant 1 : index
    %c0_48 = arith.constant 0 : index
    %c0_49 = arith.constant 0 : index
    %104 = vector.load %arg6[%c1_47, %c0_48, %c0_49] : memref<2x64x32xf32, #tpu.memory_space<vmem>>, vector<1x64x32xf32>
    %105 = vector.shape_cast %104 : vector<1x64x32xf32> to vector<64x32xf32>
    %c1_50 = arith.constant 1 : index
    %c0_51 = arith.constant 0 : index
    %c0_52 = arith.constant 0 : index
    %106 = vector.load %arg7[%c1_50, %c0_51, %c0_52] : memref<2x8x96xf32, #tpu.memory_space<vmem>>, vector<1x8x96xf32>
    %107 = vector.shape_cast %106 : vector<1x8x96xf32> to vector<8x96xf32>
    %108 = vector.extract_strided_slice %107 {offsets = [0, 0], sizes = [1, 96], strides = [1, 1]} : vector<8x96xf32> to vector<1x96xf32>
    %109 = vector.extract_strided_slice %107 {offsets = [1, 0], sizes = [1, 64], strides = [1, 1]} : vector<8x96xf32> to vector<1x64xf32>
    %110 = vector.extract_strided_slice %107 {offsets = [2, 0], sizes = [1, 32], strides = [1, 1]} : vector<8x96xf32> to vector<1x32xf32>
    %111 = vector.extract_strided_slice %107 {offsets = [3, 0], sizes = [1, 32], strides = [1, 1]} : vector<8x96xf32> to vector<1x32xf32>
    %112 = vector.extract_strided_slice %107 {offsets = [4, 0], sizes = [1, 32], strides = [1, 1]} : vector<8x96xf32> to vector<1x32xf32>
    %113 = vector.extract_strided_slice %107 {offsets = [5, 0], sizes = [1, 32], strides = [1, 1]} : vector<8x96xf32> to vector<1x32xf32>
    %114 = vector.extract_strided_slice %107 {offsets = [6, 0], sizes = [1, 32], strides = [1, 1]} : vector<8x96xf32> to vector<1x32xf32>
    %115 = vector.extract_strided_slice %107 {offsets = [7, 0], sizes = [1, 32], strides = [1, 1]} : vector<8x96xf32> to vector<1x32xf32>
    %cst_53 = arith.constant dense<0.000000e+00> : vector<16x96xf32>
    %116 = tpu.matmul %97, %99, %cst_53 {dimension_numbers = #tpu.dot_dimension_numbers<[1], [0], [0], [1], [0, 0, 1, 1], [], []>} : vector<16x32xf32>, vector<32x96xf32>, vector<16x96xf32> -> vector<16x96xf32>
    %117 = vector.broadcast %108 : vector<1x96xf32> to vector<16x96xf32>
    %118 = arith.addf %116, %117 : vector<16x96xf32>
    %119 = vector.extract_strided_slice %118 {offsets = [0, 0], sizes = [16, 32], strides = [1, 1]} : vector<16x96xf32> to vector<16x32xf32>
    %120 = vector.extract_strided_slice %118 {offsets = [0, 32], sizes = [16, 32], strides = [1, 1]} : vector<16x96xf32> to vector<16x32xf32>
    %121 = vector.extract_strided_slice %118 {offsets = [0, 64], sizes = [16, 32], strides = [1, 1]} : vector<16x96xf32> to vector<16x32xf32>
    %cst_54 = arith.constant dense<0.000000e+00> : vector<16x16xf32>
    %122 = tpu.matmul %119, %120, %cst_54 {dimension_numbers = #tpu.dot_dimension_numbers<[1], [1], [0], [0], [0, 0, 1, 0], [], []>} : vector<16x32xf32>, vector<16x32xf32>, vector<16x16xf32> -> vector<16x16xf32>
    %123 = arith.addf %122, %3 : vector<16x16xf32>
    %cst_55 = arith.constant dense<0xFF800000> : vector<16xf32>
    %124 = vector.multi_reduction <maximumf>, %123, %cst_55 [1] : vector<16x16xf32> to vector<16xf32>
    %125 = vector.shape_cast %124 : vector<16xf32> to vector<16x1xf32>
    %126 = vector.broadcast %125 : vector<16x1xf32> to vector<16x16xf32>
    %127 = arith.subf %123, %126 : vector<16x16xf32>
    %128 = math.exp %127 : vector<16x16xf32>
    %cst_56 = arith.constant dense<0.000000e+00> : vector<16xf32>
    %129 = vector.multi_reduction <add>, %128, %cst_56 [1] : vector<16x16xf32> to vector<16xf32>
    %130 = vector.shape_cast %129 : vector<16xf32> to vector<16x1xf32>
    %131 = tpu.reciprocal %130 {approx = true} : vector<16x1xf32> -> vector<16x1xf32>
    %132 = vector.broadcast %131 : vector<16x1xf32> to vector<16x16xf32>
    %133 = arith.mulf %128, %132 : vector<16x16xf32>
    %cst_57 = arith.constant dense<0.000000e+00> : vector<16x32xf32>
    %134 = tpu.matmul %133, %121, %cst_57 {dimension_numbers = #tpu.dot_dimension_numbers<[1], [0], [0], [1], [0, 0, 1, 1], [], []>} : vector<16x16xf32>, vector<16x32xf32>, vector<16x32xf32> -> vector<16x32xf32>
    %cst_58 = arith.constant dense<0.000000e+00> : vector<16x32xf32>
    %135 = tpu.matmul %134, %101, %cst_58 {dimension_numbers = #tpu.dot_dimension_numbers<[1], [0], [0], [1], [0, 0, 1, 1], [], []>} : vector<16x32xf32>, vector<32x32xf32>, vector<16x32xf32> -> vector<16x32xf32>
    %136 = vector.broadcast %110 : vector<1x32xf32> to vector<16x32xf32>
    %137 = arith.addf %135, %136 : vector<16x32xf32>
    %138 = arith.addf %97, %137 : vector<16x32xf32>
    %cst_59 = arith.constant dense<0.000000e+00> : vector<16xf32>
    %139 = vector.multi_reduction <add>, %138, %cst_59 [1] : vector<16x32xf32> to vector<16xf32>
    %140 = vector.shape_cast %139 : vector<16xf32> to vector<16x1xf32>
    %cst_60 = arith.constant 3.200000e+01 : f32
    %141 = vector.broadcast %cst_60 : f32 to vector<16x1xf32>
    %142 = arith.divf %140, %141 : vector<16x1xf32>
    %143 = arith.mulf %138, %138 : vector<16x32xf32>
    %cst_61 = arith.constant dense<0.000000e+00> : vector<16xf32>
    %144 = vector.multi_reduction <add>, %143, %cst_61 [1] : vector<16x32xf32> to vector<16xf32>
    %145 = vector.shape_cast %144 : vector<16xf32> to vector<16x1xf32>
    %cst_62 = arith.constant 3.200000e+01 : f32
    %146 = vector.broadcast %cst_62 : f32 to vector<16x1xf32>
    %147 = arith.divf %145, %146 : vector<16x1xf32>
    %148 = arith.mulf %142, %142 : vector<16x1xf32>
    %149 = arith.subf %147, %148 : vector<16x1xf32>
    %150 = vector.broadcast %142 : vector<16x1xf32> to vector<16x32xf32>
    %151 = arith.subf %138, %150 : vector<16x32xf32>
    %cst_63 = arith.constant 9.99999974E-6 : f32
    %152 = vector.broadcast %cst_63 : f32 to vector<16x1xf32>
    %153 = arith.addf %149, %152 : vector<16x1xf32>
    %154 = math.rsqrt %153 : vector<16x1xf32>
    %155 = vector.broadcast %154 : vector<16x1xf32> to vector<16x32xf32>
    %156 = arith.mulf %151, %155 : vector<16x32xf32>
    %157 = vector.broadcast %111 : vector<1x32xf32> to vector<16x32xf32>
    %158 = arith.mulf %156, %157 : vector<16x32xf32>
    %159 = vector.broadcast %112 : vector<1x32xf32> to vector<16x32xf32>
    %160 = arith.addf %158, %159 : vector<16x32xf32>
    %cst_64 = arith.constant dense<0.000000e+00> : vector<16x64xf32>
    %161 = tpu.matmul %160, %103, %cst_64 {dimension_numbers = #tpu.dot_dimension_numbers<[1], [0], [0], [1], [0, 0, 1, 1], [], []>} : vector<16x32xf32>, vector<32x64xf32>, vector<16x64xf32> -> vector<16x64xf32>
    %162 = vector.broadcast %109 : vector<1x64xf32> to vector<16x64xf32>
    %163 = arith.addf %161, %162 : vector<16x64xf32>
    %cst_65 = arith.constant 0.000000e+00 : f32
    %164 = vector.broadcast %cst_65 : f32 to vector<16x64xf32>
    %165 = arith.maximumf %163, %164 : vector<16x64xf32>
    %cst_66 = arith.constant dense<0.000000e+00> : vector<16x32xf32>
    %166 = tpu.matmul %165, %105, %cst_66 {dimension_numbers = #tpu.dot_dimension_numbers<[1], [0], [0], [1], [0, 0, 1, 1], [], []>} : vector<16x64xf32>, vector<64x32xf32>, vector<16x32xf32> -> vector<16x32xf32>
    %167 = vector.broadcast %113 : vector<1x32xf32> to vector<16x32xf32>
    %168 = arith.addf %166, %167 : vector<16x32xf32>
    %169 = arith.addf %160, %168 : vector<16x32xf32>
    %cst_67 = arith.constant dense<0.000000e+00> : vector<16xf32>
    %170 = vector.multi_reduction <add>, %169, %cst_67 [1] : vector<16x32xf32> to vector<16xf32>
    %171 = vector.shape_cast %170 : vector<16xf32> to vector<16x1xf32>
    %cst_68 = arith.constant 3.200000e+01 : f32
    %172 = vector.broadcast %cst_68 : f32 to vector<16x1xf32>
    %173 = arith.divf %171, %172 : vector<16x1xf32>
    %174 = arith.mulf %169, %169 : vector<16x32xf32>
    %cst_69 = arith.constant dense<0.000000e+00> : vector<16xf32>
    %175 = vector.multi_reduction <add>, %174, %cst_69 [1] : vector<16x32xf32> to vector<16xf32>
    %176 = vector.shape_cast %175 : vector<16xf32> to vector<16x1xf32>
    %cst_70 = arith.constant 3.200000e+01 : f32
    %177 = vector.broadcast %cst_70 : f32 to vector<16x1xf32>
    %178 = arith.divf %176, %177 : vector<16x1xf32>
    %179 = arith.mulf %173, %173 : vector<16x1xf32>
    %180 = arith.subf %178, %179 : vector<16x1xf32>
    %181 = vector.broadcast %173 : vector<16x1xf32> to vector<16x32xf32>
    %182 = arith.subf %169, %181 : vector<16x32xf32>
    %cst_71 = arith.constant 9.99999974E-6 : f32
    %183 = vector.broadcast %cst_71 : f32 to vector<16x1xf32>
    %184 = arith.addf %180, %183 : vector<16x1xf32>
    %185 = math.rsqrt %184 : vector<16x1xf32>
    %186 = vector.broadcast %185 : vector<16x1xf32> to vector<16x32xf32>
    %187 = arith.mulf %182, %186 : vector<16x32xf32>
    %188 = vector.broadcast %114 : vector<1x32xf32> to vector<16x32xf32>
    %189 = arith.mulf %187, %188 : vector<16x32xf32>
    %190 = vector.broadcast %115 : vector<1x32xf32> to vector<16x32xf32>
    %191 = arith.addf %189, %190 : vector<16x32xf32>
    %c0_72 = arith.constant 0 : index
    %c0_73 = arith.constant 0 : index
    %192 = vector.load %arg8[%c0_72, %c0_73] : memref<16x32xf32, #tpu.memory_space<vmem>>, vector<16x32xf32>
    tpu.vector_store %arg8[%c0_72, %c0_73], %191 {strides = array<i32>} : memref<16x32xf32, #tpu.memory_space<vmem>>, vector<16x32xf32>,
    return
  }
}

</mosaic_0001>

<bundles_post_ra>
// kernel: eq.1
= control target key start
LH: loop header
LB: loop body
LE: loop exit
PB: predicated region body
PF: predicated region fallthrough
CT: control target
= control target key end

     0   :  { %2 = vsyncpa [#allocation1], 0  ;;  %s58_s6 = smov [#allocation0]   ;;  %s85_s0 = inlined_call_operand.hbm [shape: s32[2,8], index: 0, kind: input, shape index: {}]   ;;  %s86_s1 = inlined_call_operand.vmem [shape: s32[16], index: 1, kind: output, shape index: {}]  }
   0x1   :  { %s7_s7 = sshll.u32 %s58_s6, 4  ;;  %s34_s10 = scalar_lea.hbm %s85_s0, 32  ;;  %s8_s7 = int_to_ptr.vmem [resolvable:$true] %s7_s7 }
   0x2   :  { %p35_p0 = scmp.ne.s32.totalorder %s85_s0, %s34_s10  ;;  %p38_p1 = scmp.lt.u32.totalorder %s34_s10, %s85_s0 }
   0x4   :  { %p40_p2 = pnand %p38_p1, %p35_p0 }
   0x6   :  { %43 = shalt.err (!%p40_p2)
}
   0x7   :  { %s44_s15 = scalar_lea.vmem %s8_s7, 32  ;;  %p49_p4 = scmp.lt.s32.totalorder %s8_s7, %s8_s7 }
   0x8   :  { %p45_p3 = scmp.ne.s32.totalorder %s8_s7, %s44_s15  ;;  %p50_p5 = scmp.lt.s32.totalorder %s44_s15, %s44_s15 }
   0xa   :  { %p51_p6 = por %p50_p5, %p49_p4 }
   0xc   :  { %p52_p7 = pnand %p51_p6, %p45_p3 }
   0xe   :  { %55 = shalt.err (!%p52_p7)
}
   0xf   :  { %10 = dma.hbm_to_vmem [thread:$0]  %s85_s0, 32, %s8_s7, [#allocation1]  }
  0x10   :  { %56 = dma.done.wait [#allocation1], 32  }
  0x11   :  { %57 = vsyncadd [#allocation1], 4294967264  ;;  %v14_v0 = vld [vmem:[#allocation0] sm:$0x3]  ;;  %vm17_vm0 = vcmask 64512   ;;  %s59_s0 = smov 8  }
  0x12   :  { %15 = vst [vmem:[#allocation3] sm:$0x3] %v14_v0  ;;  %vm23_vm1 = vcmask 130112  }
  0x19   :  { %v16_v1 = vld [vmem:[#allocation3] sm:$0x1]   ;;  %v20_v2 = vld [vmem:[#allocation3 + $0x1] sm:$0x1]  }
  0x1a   :  { %21 = vrot.lane.b32.xlu0 %v20_v2, %s59_s0  ;;  %18 = vst.msk [vmem:[#allocation2] sm:$0x1] %vm17_vm0, %v16_v1  }
  0x8c   :  { %v22_v3 = vpop.permute.xlu0 %21  }
  0x8d   :  { %24 = vst.msk [vmem:[#allocation2] sm:$0x1] %vm23_vm1, %v22_v3  }
  0x94   :  { %v28_v4 = vld [vmem:[#allocation2] sm:$0x1] }
  0x95   :  { %30 = vst [vmem:[%s86_s1] sm:$0x1] %v28_v4 }
  0x96   :  { %31 = vsyncpa [#allocation1], 1 }

// kernel: eq.24
= control target key start
LH: loop header
LB: loop body
LE: loop exit
PB: predicated region body
PF: predicated region fallthrough
CT: control target
= control target key end

     0   :  { %vm7_vm0 = vcmask 64512   ;;  %vm13_vm1 = vcmask 130112   ;;  %s39_s0 = inlined_call_operand.vmem [shape: s32[2,8], index: 0, kind: input, shape index: {}]   ;;  %s40_s1 = inlined_call_operand.vmem [shape: s32[16], index: 1, kind: output, shape index: {}]  }
   0x1   :  { %v4_v0 = vld [vmem:[%s39_s0] sm:$0x3]  ;;  %s22_s0 = smov 8  }
   0x2   :  { %5 = vst [vmem:[#allocation1] sm:$0x3] %v4_v0 }
   0x9   :  { %v10_v1 = vld [vmem:[#allocation1 + $0x1] sm:$0x1]   ;;  %v6_v2 = vld [vmem:[#allocation1] sm:$0x1]  }
   0xa   :  { %11 = vrot.lane.b32.xlu0 %v10_v1, %s22_s0  ;;  %8 = vst.msk [vmem:[#allocation0] sm:$0x1] %vm7_vm0, %v6_v2  }
  0x7c   :  { %v12_v3 = vpop.permute.xlu0 %11  }
  0x7d   :  { %14 = vst.msk [vmem:[#allocation0] sm:$0x1] %vm13_vm1, %v12_v3  }
  0x84   :  { %v18_v4 = vld [vmem:[#allocation0] sm:$0x1] }
  0x85   :  { %20 = vst [vmem:[%s40_s1] sm:$0x1] %v18_v4 }

// kernel: encoder_forward.1
= control target key start
LH: loop header
LB: loop body
LE: loop exit
PB: predicated region body
PF: predicated region fallthrough
CT: control target
= control target key end

     0   :  { %vm35_vm0 = vcmask 195584   ;;  %s2269_s0 = inlined_call_operand.vmem [shape: f32[16,24], index: 0, kind: input, shape index: {}]   ;;  %s2270_s1 = inlined_call_operand.vmem [shape: f32[24,32], index: 1, kind: input, shape index: {}]   ;;  %s2271_s2 = inlined_call_operand.vmem [shape: f32[16,16], index: 2, kind: input, shape index: {}]   ;;  %s2272_s3 = inlined_call_operand.vmem [shape: f32[2,32,96], index: 3, kind: input, shape index: {}]   ;;  %s2273_s4 = inlined_call_operand.vmem [shape: f32[2,32,32], index: 4, kind: input, shape index: {}]   ;;  %s2274_s5 = inlined_call_operand.vmem [shape: f32[2,32,64], index: 5, kind: input, shape index: {}]   ;;  %s2275_s6 = inlined_call_operand.vmem [shape: f32[2,64,32], index: 6, kind: input, shape index: {}]   ;;  %s2276_s7 = inlined_call_operand.vmem [shape: f32[2,8,96], index: 7, kind: input, shape index: {}]   ;;  %s2277_s8 = inlined_call_operand.hbm [shape: f32[16,32], index: 8, kind: output, shape index: {}]  }
   0x1   :  { %v32_v0 = vld [vmem:[%s2270_s1] sm:$0xff]  ;;  %v33_v1 = vld [vmem:[%s2270_s1 + $0x8] sm:$0xff]  ;;  %v34_v4 = vld [vmem:[%s2270_s1 + $0x10] sm:$0xff] }
   0x2   :  { %v1713_v2 = vpack.c.bf16 %v33_v1, %v32_v0  ;;  %v30_v3 = vld [vmem:[%s2269_s0] sm:$0xff]  ;;  %v120_v6 = vld [vmem:[%s2272_s3 + $0x8] sm:$0xff] }
   0x3   :  { %1578 = vmatprep.mubr.msk.f32.mxu1 %vm35_vm0, %v30_v3  ;;  %v119_v5 = vld [vmem:[%s2272_s3] sm:$0xff] }
   0x4   :  { %1714 = vmatprep.subr.bf16.mxu1 %v1713_v2 }
   0x5   :  { %13 = vsyncpa [#allocation3], 0  ;;  %1716 = vmatpush3.bf16.msra.mxu1 %v1713_v2  ;;  %v121_v7 = vld [vmem:[%s2272_s3 + $0x10] sm:$0xff]  ;;  %v122_v8 = vld [vmem:[%s2272_s3 + $0x18] sm:$0xff]  ;;  %v1717_v9 = vpack.c.bf16 %v120_v6, %v119_v5  ;;  %vm144_vm1 = vcmask 261120   ;;  %v140_v14 = vlaneseq  ;;  %s1898_s23 = smov 96  }
   0x6   :  { %1576 = vmatprep.subr.mxu1 %v34_v4  ;;  %v31_v10 = vld [vmem:[%s2269_s0 + $0x8] sm:$0xff]  ;;  %v1721_v11 = vpack.c.bf16 %v122_v8, %v121_v7  ;;  %v1991_v17 = vld [vmem:[%s2276_s7] sm:$0xff]  ;;  %vm2000_vm2 = vmpackc.low %vm144_vm1, %vm144_vm1  ;;  %vm315_vm3 = vcmask 130048   ;;  %vm646_vm4 = vcmask 523264  }
   0x7   :  { %v1985_v15 = vshrl.u32 %v140_v14, 7  ;;  %v2012_v29 = vld [vmem:[%s2271_s2 + $0x8] sm:$0xff]  ;;  %v2017_v30 = vld [vmem:[%s2271_s2] sm:$0xff]  ;;  %s1899_s2 = smov 64   ;;  %v125_v57 = vld [vmem:[%s2273_s4 + $0x10] sm:$0xff] }
   0x8   :  { %v123_v50 = vld [vmem:[%s2273_s4] sm:$0xff]  ;;  %v124_v51 = vld [vmem:[%s2273_s4 + $0x8] sm:$0xff]  ;;  %v126_v58 = vld [vmem:[%s2273_s4 + $0x18] sm:$0xff] }
   0x9   :  { %1577 = vmatpush3.msra.mxu1 %v34_v4  ;;  %v142_v16 = vsub.s32 0, %v1985_v15  ;;  %v1735_v55 = vpack.c.bf16 %v124_v51, %v123_v50  ;;  %v1739_v62 = vpack.c.bf16 %v126_v58, %v125_v57  ;;  %v427_v1 = vsub.s32 2, %v1985_v15 }
   0xa   :  { %1579 = vmatmul.mubr.msk.f32.vlgmr.msra.gmra.mrb[0].mxu1 %vm35_vm0, %v31_v10  ;;  %1718 = vmatprep.subr.bf16.mxu1 %v1717_v9  ;;  %v545_v50 = vsub.s32 3, %v1985_v15  ;;  %v551_v51 = vsub.s32 4, %v1985_v15 }
   0xb   :  { %1720 = vmatpush3.bf16.msra.mxu1 %v1717_v9  ;;  %v143_v18 = vrot.slane %v1991_v17, %v142_v16  ;;  %v428_v2 = vrot.slane %v1991_v17, %v427_v1 }
   0xc   :  { %1722 = vmatprep.subr.bf16.mxu1 %v1721_v11 }
   0xf   :  { %1724 = vmatpush3.bf16.msra.mxu1 %v1721_v11 }
  0xdd   :  { %v1977_v12 = vpop.f32.mrb[0].mxu1 }
  0xde   :  { %v1979_v13 = vpop.f32.mrb[1].mxu1 }
  0xdf   :  { %1589 = vmatprep.mubr.msk.f32.mxu1 %vm144_vm1, %v1979_v13 }
  0xe0   :  { %1590 = vmatmul.mubr.msk.f32.vlgmr.msra.gmra.mrb[2].mxu1 %vm144_vm1, %v1977_v12 }
 0x1b3   :  { %v1591_v19 = vpop.f32.mrb[2].mxu1 }
 0x1b4   :  { %v223_v20 = vadd.f32 %v1591_v19, %v143_v18  ;;  %v217_v21 = vpop.f32.mrb[3].mxu1 }
 0x1b5   :  { %v218_v22 = vadd.f32 %v217_v21, %v143_v18  ;;  %v129_v21 = vld [vmem:[%s2274_s5 + $0x10] sm:$0xff] }
 0x1b7   :  { %1596 = vmatprep.mubr.msk.f32.mxu0 %vm144_vm1, %v218_v22  ;;  %v1822_v23 = vpack.i.bf16 %v223_v20, %v218_v22  ;;  %v130_v22 = vld [vmem:[%s2274_s5 + $0x18] sm:$0xff] }
 0x1b9   :  { %1823 = vrot.lane.b32.xlu0 %v1822_v23, %s1898_s23 }
 0x22b   :  { %v1824_v24 = vpop.permute.xlu0 %1823 }
 0x22c   :  { %v1826_v25 = vunpack.i.h.bf16 %v1824_v24  ;;  %v1825_v26 = vunpack.i.l.bf16 %v1824_v24  ;;  %v131_v24 = vld [vmem:[%s2275_s6] sm:$0xff] }
 0x22e   :  { %v1725_v28 = vpack.c.bf16 %v1826_v25, %v1825_v26  ;;  %v132_v25 = vld [vmem:[%s2275_s6 + $0x8] sm:$0xff]  ;;  %v133_v26 = vld [vmem:[%s2275_s6 + $0x10] sm:$0xff] }
 0x230   :  { %1727 = vmatprep.subr.msk.bf16.mxu0 %vm2000_vm2, %v1725_v28 }
 0x231   :  { %1730 = vmatpush3.bf16.xpose.msk.msra.mxu0 %vm2000_vm2, %v1725_v28  ;;  %v1751_v28 = vpack.c.bf16 %v132_v25, %v131_v24 }
 0x238   :  { %1597 = vmatmul.mubr.msk.f32.vlgmr.msra.gmra.mrb[0].mxu0 %vm144_vm1, %v223_v20 }
 0x30b   :  { %v1598_v31 = vpop.f32.mrb[0].mxu0 }
 0x30c   :  { %v312_v32 = vadd.f32 %v1598_v31, %v2012_v29  ;;  %v306_v33 = vpop.f32.mrb[1].mxu0  ;;  %v134_v31 = vld [vmem:[%s2275_s6 + $0x18] sm:$0xff] }
 0x30d   :  { %v307_v34 = vadd.f32 %v306_v33, %v2017_v30  ;;  %v135_v33 = vld [vmem:[%s2275_s6 + $0x20] sm:$0xff] }
 0x30e   :  { %v319_v35 = vsel %vm315_vm3, %v312_v32, -inf }
 0x30f   :  { %320 = vmax.xlane.f32.xlu1 %v319_v35  ;;  %v316_v36 = vsel %vm315_vm3, %v307_v34, -inf }
 0x310   :  { %317 = vmax.xlane.f32.xlu0 %v316_v36 }
 0x39c   :  { %v321_v37 = vpop.xlane.xlu1 %320 }
 0x39d   :  { %v323_v38 = vsub.f32 %v312_v32, %v321_v37  ;;  %v318_v39 = vpop.xlane.xlu0 %317  ;;  %v1755_v32 = vpack.c.bf16 %v134_v31, %v133_v26 }
 0x39e   :  { %v322_v40 = vsub.f32 %v307_v34, %v318_v39  ;;  %v136_v34 = vld [vmem:[%s2275_s6 + $0x28] sm:$0xff] }
 0x39f   :  { %v326_v41 = vmul.f32 1.442695, %v323_v38  ;;  %v1759_v35 = vpack.c.bf16 %v136_v34, %v135_v33  ;;  %v1461_v33 = vld [vmem:[%s2272_s3 + $0x28] sm:$0xff] }
 0x3a0   :  { %v324_v42 = vmul.f32 1.442695, %v322_v40 }
 0x3a1   :  { %1842 = vpow2.f32 %v326_v41 }
 0x3a2   :  { %1844 = vpow2.f32 %v324_v42 }
 0x3ab   :  { %v1843_v43 = vpop.eup %1842 }
 0x3ac   :  { %v331_v44 = vsel %vm315_vm3, %v1843_v43, 0.0  ;;  %v1845_v45 = vpop.eup %1844 }
 0x3ad   :  { %332 = vadd.xlane.f32.xlu1 %v331_v44  ;;  %v328_v46 = vsel %vm315_vm3, %v1845_v45, 0.0 }
 0x3b1   :  { %329 = vadd.xlane.f32.xlu1 %v328_v46 }
 0x3c2   :  { %1828 = vrot.lane.b32.xlu1 %v1822_v23, %s1899_s2  ;;  %v1747_v23 = vpack.c.bf16 %v130_v22, %v129_v21 }
 0x43a   :  { %v333_v47 = vpop.xlane.xlu1 %332 }
 0x43b   :  { %1846 = vrcp.f32 %v333_v47 }
 0x43e   :  { %v330_v48 = vpop.xlane.xlu1 %329 }
 0x43f   :  { %1848 = vrcp.f32 %v330_v48 }
 0x442   :  { %v1829_v49 = vpop.permute.xlu1 %1828 }
 0x443   :  { %v1831_v52 = vunpack.i.h.bf16 %v1829_v49  ;;  %v1830_v53 = vunpack.i.l.bf16 %v1829_v49 }
 0x445   :  { %v1731_v54 = vpack.c.bf16 %v1831_v52, %v1830_v53  ;;  %v1847_v56 = vpop.eup %1846  ;;  %v546_v53 = vrot.slane %v1991_v17, %v545_v50 }
 0x446   :  { %v337_v61 = vmul.f32 %v1847_v56, %v1843_v43  ;;  %v552_v56 = vrot.slane %v1991_v17, %v551_v51 }
 0x447   :  { %1732 = vmatprep.subr.bf16.mxu1 %v1731_v54 }
 0x448   :  { %1734 = vmatpush3.bf16.msra.mxu1 %v1731_v54 }
 0x449   :  { %v1849_v59 = vpop.eup %1848  ;;  %1736 = vmatprep.subr.bf16.mxu1 %v1735_v55 }
 0x44a   :  { %v336_v60 = vmul.f32 %v1849_v59, %v1845_v45 }
 0x44c   :  { %1603 = vmatprep.mubr.msk.f32.mxu1 %vm315_vm3, %v336_v60 }
 0x44d   :  { %1604 = vmatmul.mubr.msk.f32.vlgmr.msra.gmra.mrb[4].mxu1 %vm315_vm3, %v337_v61 }
 0x44e   :  { %1738 = vmatpush3.bf16.msra.mxu1 %v1735_v55 }
 0x44f   :  { %1740 = vmatprep.subr.bf16.mxu1 %v1739_v62 }
 0x452   :  { %1742 = vmatpush3.bf16.msra.mxu1 %v1739_v62 }
 0x453   :  { %1752 = vmatprep.subr.bf16.mxu1 %v1751_v28 }
 0x520   :  { %v1605_v63 = vpop.f32.mrb[4].mxu1 }
 0x521   :  { %v416_v0 = vpop.f32.mrb[5].mxu1 }
 0x522   :  { %1614 = vmatprep.mubr.msk.f32.mxu1 %vm144_vm1, %v416_v0  ;;  %v137_v0 = vld [vmem:[%s2275_s6 + $0x30] sm:$0xff] }
 0x523   :  { %1615 = vmatmul.mubr.msk.f32.vlgmr.msra.gmra.mrb[6].mxu1 %vm144_vm1, %v1605_v63 }
 0x524   :  { %1754 = vmatpush3.bf16.msra.mxu1 %v1751_v28 }
 0x525   :  { %1756 = vmatprep.subr.bf16.mxu1 %v1755_v32 }
 0x528   :  { %1758 = vmatpush3.bf16.msra.mxu1 %v1755_v32  ;;  %v1460_v32 = vld [vmem:[%s2272_s3 + $0x20] sm:$0xff] }
 0x529   :  { %1760 = vmatprep.subr.bf16.mxu1 %v1759_v35  ;;  %v1767_v34 = vpack.c.bf16 %v1461_v33, %v1460_v32 }
 0x52c   :  { %1762 = vmatpush3.bf16.msra.mxu1 %v1759_v35  ;;  %v1462_v35 = vld [vmem:[%s2272_s3 + $0x30] sm:$0xff] }
 0x5f6   :  { %v1616_v3 = vpop.f32.mrb[6].mxu1 }
 0x5f7   :  { %v507_v4 = vadd.f32 %v1616_v3, %v428_v2  ;;  %v501_v5 = vpop.f32.mrb[7].mxu1 }
 0x5f8   :  { %v502_v6 = vadd.f32 %v501_v5, %v428_v2  ;;  %v138_v2 = vld [vmem:[%s2275_s6 + $0x38] sm:$0xff] }
 0x5f9   :  { %v2047_v7 = vadd.f32 %v1977_v12, %v507_v4  ;;  %v127_v12 = vld [vmem:[%s2274_s5] sm:$0xff]  ;;  %v1763_v3 = vpack.c.bf16 %v138_v2, %v137_v0  ;;  %v557_v4 = vsub.s32 1, %v1985_v15 }
 0x5fa   :  { %v510_v8 = vadd.f32 %v502_v6, %v1979_v13  ;;  %v128_v13 = vld [vmem:[%s2274_s5 + $0x8] sm:$0xff] }
 0x5fb   :  { %v515_v9 = vsel %vm144_vm1, %v2047_v7, 0.0  ;;  %v522_v18 = vmul.f32 %v2047_v7, %v2047_v7  ;;  %v1743_v20 = vpack.c.bf16 %v128_v13, %v127_v12  ;;  %1764 = vmatprep.subr.bf16.mxu1 %v1763_v3  ;;  %v558_v5 = vrot.slane %v1991_v17, %v557_v4 }
 0x5fc   :  { %516 = vadd.xlane.f32.xlu0 %v515_v9  ;;  %v512_v10 = vsel %vm144_vm1, %v510_v8, 0.0  ;;  %v521_v11 = vmul.f32 %v510_v8, %v510_v8  ;;  %1766 = vmatpush3.bf16.msra.mxu1 %v1763_v3 }
 0x5fd   :  { %513 = vadd.xlane.f32.xlu1 %v512_v10  ;;  %v526_v19 = vsel %vm144_vm1, %v522_v18, 0.0  ;;  %1744 = vmatprep.subr.bf16.mxu0 %v1743_v20 }
 0x5fe   :  { %v523_v14 = vsel %vm144_vm1, %v521_v11, 0.0  ;;  %1746 = vmatpush3.bf16.msra.mxu0 %v1743_v20 }
 0x5ff   :  { %1748 = vmatprep.subr.bf16.mxu0 %v1747_v23 }
 0x600   :  { %524 = vadd.xlane.f32.xlu0 %v523_v14  ;;  %v644_v14 = vsub.s32 5, %v1985_v15 }
 0x602   :  { %1750 = vmatpush3.bf16.msra.mxu0 %v1747_v23  ;;  %v645_v18 = vrot.slane %v1991_v17, %v644_v14 }
 0x603   :  { %1768 = vmatprep.subr.bf16.mxu0 %v1767_v34 }
 0x604   :  { %527 = vadd.xlane.f32.xlu0 %v526_v19 }
 0x689   :  { %v517_v36 = vpop.xlane.xlu0 %516 }
 0x68a   :  { %v514_v37 = vpop.xlane.xlu1 %513  ;;  %v520_v41 = vmul.f32 0.03125, %v517_v36  ;;  %v1463_v36 = vld [vmem:[%s2272_s3 + $0x38] sm:$0xff] }
 0x68b   :  { %v519_v38 = vmul.f32 0.03125, %v514_v37  ;;  %v1771_v37 = vpack.c.bf16 %v1463_v36, %v1462_v35  ;;  %v1464_v35 = vld [vmem:[%s2273_s4 + $0x20] sm:$0xff]  ;;  %v1465_v36 = vld [vmem:[%s2273_s4 + $0x28] sm:$0xff] }
 0x68c   :  { %v532_v45 = vmul.f32 %v520_v41, %v520_v41  ;;  %v536_v57 = vsub.f32 %v2047_v7, %v520_v41 }
 0x68d   :  { %v531_v39 = vmul.f32 %v519_v38, %v519_v38  ;;  %v525_v40 = vpop.xlane.xlu0 %524  ;;  %v535_v52 = vsub.f32 %v510_v8, %v519_v38 }
 0x68e   :  { %v529_v42 = vmul.f32 0.03125, %v525_v40 }
 0x690   :  { %v533_v43 = vsub.f32 %v529_v42, %v531_v39 }
 0x691   :  { %v528_v44 = vpop.xlane.xlu0 %527 }
 0x692   :  { %v537_v46 = vadd.f32 1e-05, %v533_v43  ;;  %v530_v47 = vmul.f32 0.03125, %v528_v44 }
 0x694   :  { %1850 = vrsqrt.f32 %v537_v46  ;;  %v534_v48 = vsub.f32 %v530_v47, %v532_v45 }
 0x696   :  { %v538_v49 = vadd.f32 1e-05, %v534_v48 }
 0x698   :  { %1852 = vrsqrt.f32 %v538_v49 }
 0x69e   :  { %v1851_v54 = vpop.eup %1850 }
 0x69f   :  { %v541_v55 = vmul.f32 %v1851_v54, %v535_v52  ;;  %v762_v54 = vsub.s32 6, %v1985_v15 }
 0x6a1   :  { %v547_v58 = vmul.f32 %v546_v53, %v541_v55  ;;  %v768_v55 = vsub.s32 7, %v1985_v15 }
 0x6a2   :  { %v1853_v59 = vpop.eup %1852 }
 0x6a3   :  { %v542_v60 = vmul.f32 %v1853_v59, %v536_v57  ;;  %v553_v61 = vadd.f32 %v552_v56, %v547_v58  ;;  %v763_v57 = vrot.slane %v1991_v17, %v762_v54 }
 0x6a5   :  { %v548_v62 = vmul.f32 %v546_v53, %v542_v60  ;;  %1625 = vmatprep.mubr.msk.f32.mxu0 %vm144_vm1, %v553_v61  ;;  %v769_v60 = vrot.slane %v1991_v17, %v768_v55 }
 0x6a7   :  { %v554_v63 = vadd.f32 %v552_v56, %v548_v62 }
 0x6a9   :  { %1626 = vmatmul.mubr.msk.f32.vlgmr.msra.gmra.mrb[2].mxu0 %vm144_vm1, %v554_v63 }
 0x6aa   :  { %1770 = vmatpush3.bf16.msra.mxu0 %v1767_v34 }
 0x6ab   :  { %1772 = vmatprep.subr.bf16.mxu0 %v1771_v37 }
 0x6ae   :  { %1774 = vmatpush3.bf16.msra.mxu0 %v1771_v37  ;;  %v1466_v37 = vld [vmem:[%s2273_s4 + $0x30] sm:$0xff] }
 0x77c   :  { %v1627_v6 = vpop.f32.mrb[2].mxu0 }
 0x77d   :  { %v637_v7 = vadd.f32 %v1627_v6, %v558_v5  ;;  %v631_v8 = vpop.f32.mrb[3].mxu0  ;;  %v2149_v6 = vld [vmem:[%s2276_s7 + $0x8] sm:$0xff] }
 0x77e   :  { %v632_v9 = vadd.f32 %v631_v8, %v558_v5  ;;  %v801_v17 = vrot.slane %v2149_v6, %v142_v16 }
 0x77f   :  { %v641_v11 = vmax.f32 %v637_v7, 0.0 }
 0x780   :  { %v640_v10 = vmax.f32 %v632_v9, 0.0 }
 0x782   :  { %1644 = vmatprep.mubr.msk.f32.mxu1 %vm646_vm4, %v640_v10 }
 0x783   :  { %1645 = vmatmul.mubr.msk.f32.vlgmr.msra.gmra.mrb[8].mxu1 %vm646_vm4, %v641_v11 }
 0x856   :  { %v1646_v19 = vpop.f32.mrb[8].mxu1 }
 0x857   :  { %v725_v12 = vadd.f32 %v1646_v19, %v645_v18  ;;  %v719_v13 = vpop.f32.mrb[9].mxu1 }
 0x858   :  { %v720_v20 = vadd.f32 %v719_v13, %v645_v18 }
 0x859   :  { %v729_v21 = vadd.f32 %v725_v12, %v554_v63 }
 0x85a   :  { %v728_v22 = vadd.f32 %v720_v20, %v553_v61 }
 0x85b   :  { %v733_v23 = vsel %vm144_vm1, %v729_v21, 0.0  ;;  %v739_v28 = vmul.f32 %v729_v21, %v729_v21 }
 0x85c   :  { %734 = vadd.xlane.f32.xlu0 %v733_v23  ;;  %v730_v24 = vsel %vm144_vm1, %v728_v22, 0.0  ;;  %v738_v25 = vmul.f32 %v728_v22, %v728_v22 }
 0x85d   :  { %v743_v31 = vsel %vm144_vm1, %v739_v28, 0.0 }
 0x85e   :  { %v740_v26 = vsel %vm144_vm1, %v738_v25, 0.0 }
 0x860   :  { %731 = vadd.xlane.f32.xlu0 %v730_v24 }
 0x864   :  { %741 = vadd.xlane.f32.xlu0 %v740_v26 }
 0x868   :  { %744 = vadd.xlane.f32.xlu0 %v743_v31 }
 0x8e9   :  { %v735_v38 = vpop.xlane.xlu0 %734 }
 0x8ea   :  { %v737_v42 = vmul.f32 0.03125, %v735_v38  ;;  %v1785_v38 = vpack.c.bf16 %v1465_v36, %v1464_v35 }
 0x8ec   :  { %v749_v47 = vmul.f32 %v737_v42, %v737_v42  ;;  %v753_v61 = vsub.f32 %v729_v21, %v737_v42 }
 0x8ed   :  { %v732_v39 = vpop.xlane.xlu0 %731 }
 0x8ee   :  { %v736_v40 = vmul.f32 0.03125, %v732_v39  ;;  %v1467_v39 = vld [vmem:[%s2273_s4 + $0x38] sm:$0xff] }
 0x8f0   :  { %v748_v43 = vmul.f32 %v736_v40, %v736_v40  ;;  %v752_v56 = vsub.f32 %v728_v22, %v736_v40  ;;  %v1789_v40 = vpack.c.bf16 %v1467_v39, %v1466_v37 }
 0x8f1   :  { %v742_v41 = vpop.xlane.xlu0 %741 }
 0x8f2   :  { %v746_v44 = vmul.f32 0.03125, %v742_v41 }
 0x8f4   :  { %v750_v45 = vsub.f32 %v746_v44, %v748_v43 }
 0x8f5   :  { %v745_v46 = vpop.xlane.xlu0 %744 }
 0x8f6   :  { %v754_v48 = vadd.f32 1e-05, %v750_v45  ;;  %v747_v49 = vmul.f32 0.03125, %v745_v46 }
 0x8f8   :  { %1854 = vrsqrt.f32 %v754_v48  ;;  %v751_v52 = vsub.f32 %v747_v49, %v749_v47 }
 0x8fa   :  { %v755_v53 = vadd.f32 1e-05, %v751_v52 }
 0x8fc   :  { %1856 = vrsqrt.f32 %v755_v53 }
 0x902   :  { %v1855_v58 = vpop.eup %1854 }
 0x903   :  { %v758_v59 = vmul.f32 %v1855_v58, %v752_v56 }
 0x905   :  { %v764_v62 = vmul.f32 %v763_v57, %v758_v59 }
 0x906   :  { %v1857_v63 = vpop.eup %1856 }
 0x907   :  { %v759_v0 = vmul.f32 %v1857_v63, %v753_v61  ;;  %v2138_v2 = vadd.f32 %v769_v60, %v764_v62 }
 0x909   :  { %v765_v3 = vmul.f32 %v763_v57, %v759_v0  ;;  %1655 = vmatprep.mubr.msk.f32.mxu0 %vm144_vm1, %v2138_v2  ;;  %v1084_v57 = vrot.slane %v2149_v6, %v427_v1 }
 0x90b   :  { %v2142_v5 = vadd.f32 %v769_v60, %v765_v3 }
 0x90d   :  { %1656 = vmatmul.mubr.msk.f32.vlgmr.msra.gmra.mrb[4].mxu0 %vm144_vm1, %v2142_v5 }
 0x9e0   :  { %v1657_v7 = vpop.f32.mrb[4].mxu0 }
 0x9e1   :  { %v880_v8 = vadd.f32 %v1657_v7, %v801_v17  ;;  %v874_v9 = vpop.f32.mrb[5].mxu0 }
 0x9e2   :  { %v875_v10 = vadd.f32 %v874_v9, %v801_v17 }
 0x9e4   :  { %1662 = vmatprep.mubr.msk.f32.mxu0 %vm144_vm1, %v875_v10  ;;  %v1832_v11 = vpack.i.bf16 %v880_v8, %v875_v10  ;;  %v1470_v10 = vld [vmem:[%s2274_s5 + $0x30] sm:$0xff] }
 0x9e6   :  { %1833 = vrot.lane.b32.xlu0 %v1832_v11, %s1898_s23 }
 0xa58   :  { %v1834_v18 = vpop.permute.xlu0 %1833 }
 0xa59   :  { %v1836_v19 = vunpack.i.h.bf16 %v1834_v18  ;;  %v1835_v12 = vunpack.i.l.bf16 %v1834_v18 }
 0xa5b   :  { %v1775_v13 = vpack.c.bf16 %v1836_v19, %v1835_v12  ;;  %v1472_v19 = vld [vmem:[%s2275_s6 + $0x40] sm:$0xff]  ;;  %v1473_v12 = vld [vmem:[%s2275_s6 + $0x48] sm:$0xff] }
 0xa5d   :  { %1777 = vmatprep.subr.msk.bf16.mxu0 %vm2000_vm2, %v1775_v13 }
 0xa5e   :  { %1780 = vmatpush3.bf16.xpose.msk.msra.mxu0 %vm2000_vm2, %v1775_v13  ;;  %v1474_v13 = vld [vmem:[%s2275_s6 + $0x50] sm:$0xff] }
 0xa5f   :  { %1786 = vmatprep.subr.bf16.mxu0 %v1785_v38 }
 0xa65   :  { %1663 = vmatmul.mubr.msk.f32.vlgmr.msra.gmra.mrb[6].mxu0 %vm144_vm1, %v880_v8 }
 0xa66   :  { %1788 = vmatpush3.bf16.msra.mxu0 %v1785_v38 }
 0xa67   :  { %1790 = vmatprep.subr.bf16.mxu0 %v1789_v40 }
 0xa6a   :  { %1792 = vmatpush3.bf16.msra.mxu0 %v1789_v40  ;;  %v1201_v40 = vrot.slane %v2149_v6, %v545_v50  ;;  %v1478_v50 = vld [vmem:[%s2275_s6 + $0x70] sm:$0xff] }
 0xb38   :  { %v1664_v16 = vpop.f32.mrb[6].mxu0 }
 0xb39   :  { %v963_v20 = vpop.f32.mrb[7].mxu0  ;;  %v969_v22 = vadd.f32 %v1664_v16, %v2012_v29  ;;  %v1801_v16 = vpack.c.bf16 %v1473_v12, %v1472_v19 }
 0xb3a   :  { %v964_v21 = vadd.f32 %v963_v20, %v2017_v30  ;;  %v1475_v20 = vld [vmem:[%s2275_s6 + $0x58] sm:$0xff] }
 0xb3b   :  { %v975_v24 = vsel %vm315_vm3, %v969_v22, -inf  ;;  %1802 = vmatprep.subr.bf16.mxu0 %v1801_v16 }
 0xb3c   :  { %v972_v23 = vsel %vm315_vm3, %v964_v21, -inf }
 0xb3d   :  { %973 = vmax.xlane.f32.xlu1 %v972_v23  ;;  %v1477_v23 = vld [vmem:[%s2275_s6 + $0x68] sm:$0xff] }
 0xb41   :  { %976 = vmax.xlane.f32.xlu1 %v975_v24 }
 0xbca   :  { %v974_v25 = vpop.xlane.xlu1 %973 }
 0xbcb   :  { %v978_v26 = vsub.f32 %v964_v21, %v974_v25  ;;  %v1805_v21 = vpack.c.bf16 %v1475_v20, %v1474_v13 }
 0xbcd   :  { %v980_v27 = vmul.f32 1.442695, %v978_v26 }
 0xbce   :  { %v977_v28 = vpop.xlane.xlu1 %976 }
 0xbcf   :  { %v979_v31 = vsub.f32 %v969_v22, %v977_v28  ;;  %v1476_v22 = vld [vmem:[%s2275_s6 + $0x60] sm:$0xff] }
 0xbd0   :  { %v1809_v24 = vpack.c.bf16 %v1477_v23, %v1476_v22 }
 0xbd1   :  { %v982_v32 = vmul.f32 1.442695, %v979_v31 }
 0xbd3   :  { %1858 = vpow2.f32 %v982_v32 }
 0xbd4   :  { %1860 = vpow2.f32 %v980_v27 }
 0xbdd   :  { %v1859_v33 = vpop.eup %1858 }
 0xbde   :  { %v987_v34 = vsel %vm315_vm3, %v1859_v33, 0.0  ;;  %v1861_v30 = vpop.eup %1860 }
 0xbdf   :  { %988 = vadd.xlane.f32.xlu1 %v987_v34  ;;  %v984_v29 = vsel %vm315_vm3, %v1861_v30, 0.0 }
 0xbe3   :  { %985 = vadd.xlane.f32.xlu1 %v984_v29 }
 0xbf4   :  { %1838 = vrot.lane.b32.xlu1 %v1832_v11, %s1899_s2  ;;  %v1471_v11 = vld [vmem:[%s2274_s5 + $0x38] sm:$0xff] }
 0xbf5   :  { %v1797_v18 = vpack.c.bf16 %v1471_v11, %v1470_v10 }
 0xc6c   :  { %v989_v41 = vpop.xlane.xlu1 %988 }
 0xc6d   :  { %1862 = vrcp.f32 %v989_v41 }
 0xc70   :  { %v986_v42 = vpop.xlane.xlu1 %985 }
 0xc71   :  { %1864 = vrcp.f32 %v986_v42 }
 0xc74   :  { %v1839_v43 = vpop.permute.xlu1 %1838 }
 0xc75   :  { %v1841_v44 = vunpack.i.h.bf16 %v1839_v43  ;;  %v1840_v45 = vunpack.i.l.bf16 %v1839_v43  ;;  %v1207_v43 = vrot.slane %v2149_v6, %v551_v51 }
 0xc77   :  { %v1781_v46 = vpack.c.bf16 %v1841_v44, %v1840_v45  ;;  %v1863_v47 = vpop.eup %1862 }
 0xc78   :  { %v993_v52 = vmul.f32 %v1863_v47, %v1859_v33 }
 0xc79   :  { %1782 = vmatprep.subr.bf16.mxu1 %v1781_v46 }
 0xc7a   :  { %1784 = vmatpush3.bf16.msra.mxu1 %v1781_v46 }
 0xc7b   :  { %v1865_v48 = vpop.eup %1864 }
 0xc7c   :  { %v992_v49 = vmul.f32 %v1865_v48, %v1861_v30 }
 0xc7e   :  { %1669 = vmatprep.mubr.msk.f32.mxu1 %vm315_vm3, %v992_v49 }
 0xc7f   :  { %1670 = vmatmul.mubr.msk.f32.vlgmr.msra.gmra.mrb[10].mxu1 %vm315_vm3, %v993_v52 }
 0xd52   :  { %v1671_v53 = vpop.f32.mrb[10].mxu1 }
 0xd53   :  { %v1072_v56 = vpop.f32.mrb[11].mxu1 }
 0xd54   :  { %1680 = vmatprep.mubr.msk.f32.mxu0 %vm144_vm1, %v1072_v56  ;;  %v1213_v56 = vrot.slane %v2149_v6, %v557_v4 }
 0xd55   :  { %1681 = vmatmul.mubr.msk.f32.vlgmr.msra.gmra.mrb[8].mxu0 %vm144_vm1, %v1671_v53  ;;  %v1479_v53 = vld [vmem:[%s2275_s6 + $0x78] sm:$0xff]  ;;  %s1900_s6 = smov [#allocation2]  }
 0xd56   :  { %1804 = vmatpush3.bf16.msra.mxu0 %v1801_v16  ;;  %v1813_v51 = vpack.c.bf16 %v1479_v53, %v1478_v50  ;;  %s1433_s24 = sshll.u32 %s1900_s6, 4  ;;  %s1434_s24 = int_to_ptr.vmem [resolvable:$true] %s1433_s24 }
 0xd57   :  { %1806 = vmatprep.subr.bf16.mxu0 %v1805_v21  ;;  %s1874_s25 = scalar_lea.vmem %s1434_s24, 256  ;;  %p1879_p1 = scmp.lt.s32.totalorder %s1434_s24, %s1434_s24 }
 0xd58   :  { %p1875_p0 = scmp.ne.s32.totalorder %s1434_s24, %s1874_s25  ;;  %p1880_p2 = scmp.lt.s32.totalorder %s1874_s25, %s1874_s25 }
 0xd5a   :  { %1808 = vmatpush3.bf16.msra.mxu0 %v1805_v21  ;;  %p1881_p3 = por %p1880_p2, %p1879_p1 }
 0xd5b   :  { %1810 = vmatprep.subr.bf16.mxu0 %v1809_v24 }
 0xd5c   :  { %p1882_p4 = pnand %p1881_p3, %p1875_p0 }
 0xd5e   :  { %1812 = vmatpush3.bf16.msra.mxu0 %v1809_v24 }
 0xd5f   :  { %1814 = vmatprep.subr.bf16.mxu0 %v1813_v51 }
 0xd62   :  { %1816 = vmatpush3.bf16.msra.mxu0 %v1813_v51 }
 0xe28   :  { %v1682_v58 = vpop.f32.mrb[8].mxu0 }
 0xe29   :  { %v1163_v59 = vadd.f32 %v1682_v58, %v1084_v57  ;;  %v1157_v60 = vpop.f32.mrb[9].mxu0 }
 0xe2a   :  { %v1158_v61 = vadd.f32 %v1157_v60, %v1084_v57 }
 0xe2b   :  { %v1167_v62 = vadd.f32 %v1163_v59, %v2142_v5  ;;  %v1468_v5 = vld [vmem:[%s2274_s5 + $0x20] sm:$0xff] }
 0xe2c   :  { %v1166_v63 = vadd.f32 %v1158_v61, %v2138_v2  ;;  %v1469_v2 = vld [vmem:[%s2274_s5 + $0x28] sm:$0xff] }
 0xe2d   :  { %v1171_v0 = vsel %vm144_vm1, %v1167_v62, 0.0  ;;  %v1177_v8 = vmul.f32 %v1167_v62, %v1167_v62  ;;  %v1793_v9 = vpack.c.bf16 %v1469_v2, %v1468_v5 }
 0xe2e   :  { %1172 = vadd.xlane.f32.xlu1 %v1171_v0  ;;  %v1168_v3 = vsel %vm144_vm1, %v1166_v63, 0.0  ;;  %v1176_v17 = vmul.f32 %v1166_v63, %v1166_v63 }
 0xe2f   :  { %1169 = vadd.xlane.f32.xlu0 %v1168_v3  ;;  %v1181_v1 = vsel %vm144_vm1, %v1177_v8, 0.0  ;;  %1794 = vmatprep.subr.bf16.mxu1 %v1793_v9 }
 0xe30   :  { %v1178_v7 = vsel %vm144_vm1, %v1176_v17, 0.0  ;;  %1796 = vmatpush3.bf16.msra.mxu1 %v1793_v9 }
 0xe31   :  { %1798 = vmatprep.subr.bf16.mxu1 %v1797_v18 }
 0xe33   :  { %1179 = vadd.xlane.f32.xlu0 %v1178_v7 }
 0xe34   :  { %1800 = vmatpush3.bf16.msra.mxu1 %v1797_v18 }
 0xe37   :  { %1182 = vadd.xlane.f32.xlu0 %v1181_v1 }
 0xebb   :  { %v1173_v28 = vpop.xlane.xlu1 %1172 }
 0xebc   :  { %v1170_v25 = vpop.xlane.xlu0 %1169  ;;  %v1175_v27 = vmul.f32 0.03125, %v1173_v28 }
 0xebd   :  { %v1174_v26 = vmul.f32 0.03125, %v1170_v25 }
 0xebe   :  { %v1187_v29 = vmul.f32 %v1175_v27, %v1175_v27  ;;  %v1191_v44 = vsub.f32 %v1167_v62, %v1175_v27  ;;  %v1417_v27 = vrot.slane %v2149_v6, %v762_v54 }
 0xebf   :  { %v1186_v32 = vmul.f32 %v1174_v26, %v1174_v26  ;;  %v1190_v39 = vsub.f32 %v1166_v63, %v1174_v26  ;;  %v1300_v63 = vrot.slane %v2149_v6, %v644_v14 }
 0xec0   :  { %v1180_v31 = vpop.xlane.xlu0 %1179 }
 0xec1   :  { %v1184_v33 = vmul.f32 0.03125, %v1180_v31 }
 0xec3   :  { %v1188_v34 = vsub.f32 %v1184_v33, %v1186_v32 }
 0xec4   :  { %v1183_v30 = vpop.xlane.xlu0 %1182 }
 0xec5   :  { %v1192_v35 = vadd.f32 1e-05, %v1188_v34  ;;  %v1185_v36 = vmul.f32 0.03125, %v1183_v30  ;;  %v1423_v34 = vrot.slane %v2149_v6, %v768_v55 }
 0xec7   :  { %1866 = vrsqrt.f32 %v1192_v35  ;;  %v1189_v37 = vsub.f32 %v1185_v36, %v1187_v29 }
 0xec9   :  { %v1193_v38 = vadd.f32 1e-05, %v1189_v37 }
 0xecb   :  { %1868 = vrsqrt.f32 %v1193_v38 }
 0xed1   :  { %v1867_v41 = vpop.eup %1866 }
 0xed2   :  { %v1196_v42 = vmul.f32 %v1867_v41, %v1190_v39 }
 0xed4   :  { %v1202_v45 = vmul.f32 %v1201_v40, %v1196_v42 }
 0xed5   :  { %v1869_v46 = vpop.eup %1868 }
 0xed6   :  { %v1197_v47 = vmul.f32 %v1869_v46, %v1191_v44  ;;  %v1208_v48 = vadd.f32 %v1207_v43, %v1202_v45 }
 0xed8   :  { %v1203_v49 = vmul.f32 %v1201_v40, %v1197_v47  ;;  %1691 = vmatprep.mubr.msk.f32.mxu1 %vm144_vm1, %v1208_v48 }
 0xeda   :  { %v1209_v52 = vadd.f32 %v1207_v43, %v1203_v49 }
 0xedc   :  { %1692 = vmatmul.mubr.msk.f32.vlgmr.msra.gmra.mrb[12].mxu1 %vm144_vm1, %v1209_v52 }
 0xfaf   :  { %v1693_v57 = vpop.f32.mrb[12].mxu1 }
 0xfb0   :  { %v1292_v58 = vadd.f32 %v1693_v57, %v1213_v56  ;;  %v1286_v59 = vpop.f32.mrb[13].mxu1 }
 0xfb1   :  { %v1287_v60 = vadd.f32 %v1286_v59, %v1213_v56 }
 0xfb2   :  { %v1296_v62 = vmax.f32 %v1292_v58, 0.0 }
 0xfb3   :  { %v1295_v61 = vmax.f32 %v1287_v60, 0.0 }
 0xfb5   :  { %1710 = vmatprep.mubr.msk.f32.mxu0 %vm646_vm4, %v1295_v61 }
 0xfb6   :  { %1711 = vmatmul.mubr.msk.f32.vlgmr.msra.gmra.mrb[10].mxu0 %vm646_vm4, %v1296_v62 }
0x1089   :  { %v1712_v0 = vpop.f32.mrb[10].mxu0 }
0x108a   :  { %v1379_v3 = vadd.f32 %v1712_v0, %v1300_v63  ;;  %v1373_v17 = vpop.f32.mrb[11].mxu0 }
0x108b   :  { %v1374_v7 = vadd.f32 %v1373_v17, %v1300_v63 }
0x108c   :  { %v1383_v8 = vadd.f32 %v1379_v3, %v1209_v52 }
0x108d   :  { %v1382_v4 = vadd.f32 %v1374_v7, %v1208_v48 }
0x108e   :  { %v1387_v1 = vsel %vm144_vm1, %v1383_v8, 0.0  ;;  %v1393_v5 = vmul.f32 %v1383_v8, %v1383_v8 }
0x108f   :  { %1388 = vadd.xlane.f32.xlu0 %v1387_v1  ;;  %v1384_v9 = vsel %vm144_vm1, %v1382_v4, 0.0  ;;  %v1392_v10 = vmul.f32 %v1382_v4, %v1382_v4 }
0x1090   :  { %v1397_v2 = vsel %vm144_vm1, %v1393_v5, 0.0 }
0x1091   :  { %1398 = vadd.xlane.f32.xlu1 %v1397_v2  ;;  %v1394_v11 = vsel %vm144_vm1, %v1392_v10, 0.0 }
0x1093   :  { %1385 = vadd.xlane.f32.xlu0 %v1384_v9 }
0x1097   :  { %1395 = vadd.xlane.f32.xlu0 %v1394_v11 }
0x111c   :  { %v1389_v14 = vpop.xlane.xlu0 %1388 }
0x111d   :  { %v1391_v18 = vmul.f32 0.03125, %v1389_v14 }
0x111e   :  { %v1399_v19 = vpop.xlane.xlu1 %1398 }
0x111f   :  { %v1403_v12 = vmul.f32 %v1391_v18, %v1391_v18  ;;  %v1401_v13 = vmul.f32 0.03125, %v1399_v19  ;;  %v1407_v31 = vsub.f32 %v1383_v8, %v1391_v18 }
0x1120   :  { %v1386_v16 = vpop.xlane.xlu0 %1385 }
0x1121   :  { %v1405_v20 = vsub.f32 %v1401_v13, %v1403_v12  ;;  %v1390_v21 = vmul.f32 0.03125, %v1386_v16 }
0x1123   :  { %v1409_v22 = vadd.f32 1e-05, %v1405_v20  ;;  %v1402_v24 = vmul.f32 %v1390_v21, %v1390_v21  ;;  %v1406_v29 = vsub.f32 %v1382_v4, %v1390_v21 }
0x1124   :  { %v1396_v23 = vpop.xlane.xlu0 %1395 }
0x1125   :  { %1870 = vrsqrt.f32 %v1409_v22  ;;  %v1400_v25 = vmul.f32 0.03125, %v1396_v23 }
0x1127   :  { %v1404_v26 = vsub.f32 %v1400_v25, %v1402_v24 }
0x1129   :  { %v1408_v28 = vadd.f32 1e-05, %v1404_v26 }
0x112b   :  { %1872 = vrsqrt.f32 %v1408_v28 }
0x112f   :  { %v1871_v32 = vpop.eup %1870 }
0x1130   :  { %v1413_v33 = vmul.f32 %v1871_v32, %v1407_v31 }
0x1132   :  { %v1419_v30 = vmul.f32 %v1417_v27, %v1413_v33 }
0x1134   :  { %v1425_v35 = vadd.f32 %v1423_v34, %v1419_v30 }
0x1135   :  { %v1873_v36 = vpop.eup %1872 }
0x1136   :  { %v1412_v37 = vmul.f32 %v1873_v36, %v1406_v29  ;;  %1427 = vst.msk [vmem:[#allocation2 + $0x8] sm:$0xff] %vm144_vm1, %v1425_v35 }
0x1138   :  { %v1418_v38 = vmul.f32 %v1417_v27, %v1412_v37 }
0x113a   :  { %v1424_v39 = vadd.f32 %v1423_v34, %v1418_v38 }
0x113c   :  { %1426 = vst.msk [vmem:[#allocation2] sm:$0xff] %vm144_vm1, %v1424_v39 }
0x113d   :  { %1885 = shalt.err (!%p1882_p4)
}
0x113e   :  { %s1886_s28 = scalar_lea.hbm %s2277_s8, 256 }
0x113f   :  { %p1887_p5 = scmp.ne.s32.totalorder %s2277_s8, %s1886_s28  ;;  %p1890_p6 = scmp.lt.u32.totalorder %s1886_s28, %s2277_s8 }
0x1141   :  { %p1892_p7 = pnand %p1890_p6, %p1887_p5 }
0x1143   :  { %1895 = shalt.err (!%p1892_p7)
}
0x1144   :  { %s1901_s9 = smov 128   ;;  %s1902_s10 = smov 8  }
0x1145   :  { %1439 = dma.vmem_to_hbm [thread:$0]  %s1434_s24, 256, %s2277_s8, [#allocation3], %s1901_s9, %s1901_s9, %s1902_s10  }
0x1146   :  { %1896 = dma.done.wait [#allocation3], 256  }
0x1147   :  { %1897 = vsyncadd [#allocation3], 4294967040 }
0x1148   :  { %1443 = vsyncpa [#allocation3], 1 }

</bundles_post_ra>
